<compile_context>
chip_gen: v6e
topology: v6e:2x2x1
jax: 0.10.0
libtpu: 0.0.40
codegen_flags: <defaults>
</compile_context>

<pallas_src>
import jax
import jax.numpy as jnp
from jax.experimental import pallas as pl
from jax.experimental.pallas import tpu as pltpu

_LANES = 128
_SUBLANES = 8
_DEFAULT_BLOCK_ROWS = 4096          # 4096 x 128 x 4 B = 2 MiB per f32 tile
_MIN_GRID_STEPS = 8                 # let v7x shard grid steps across its 2 TCs
_VMEM_LIMIT_BYTES = 32 * 1024 * 1024


def _round_up(a, b):
    return ((a + b - 1) // b) * b


def _pick_block_rows(rows, block_rows):
    """Block rows: multiple of 8, <= requested size, and small enough that the
    grid has >= _MIN_GRID_STEPS steps for large inputs.  Falls back to the
    full row extent (always legal) for tiny inputs."""
    cap = _round_up(max(1, (rows + _MIN_GRID_STEPS - 1) // _MIN_GRID_STEPS),
                    _SUBLANES)
    br = min(_round_up(max(block_rows, _SUBLANES), _SUBLANES), cap)
    if br >= rows:
        return rows                 # full-extent block: no divisibility rule
    return br


# ----------------------------------------------------------------------------
# kernels
# ----------------------------------------------------------------------------
def _my_feature_kernel(x_ref, y_ref, mu1_ref, mu2_ref, o_ref):
    # exp(-2*((x-mu1)^2 + (y-mu2)^2)); VPU for the quadratic, EUP for exp.
    dx = x_ref[...] - mu1_ref[...]
    dy = y_ref[...] - mu2_ref[...]
    o_ref[...] = jnp.exp(-2.0 * (dx * dx + dy * dy))


def _my_feature_scalar_mu_kernel(mu_ref, x_ref, y_ref, o_ref):
    # mu_ref is a (2,) f32 array in SMEM: [mu1, mu2] (batch-constant case).
    dx = x_ref[...] - mu_ref[0]
    dy = y_ref[...] - mu_ref[1]
    o_ref[...] = jnp.exp(-2.0 * (dx * dx + dy * dy))


# ----------------------------------------------------------------------------
# wrapper
# ----------------------------------------------------------------------------
def my_feature(x, y, mu1, mu2, *, block_rows=_DEFAULT_BLOCK_ROWS):
    """exp(-2*(x-mu1)^2 - 2*(y-mu2)^2).

    x, y: float arrays of identical shape (typically [N, 1]).
    mu1, mu2: either arrays of the same shape as x (module semantics) or
              scalars / size-1 arrays (batch-constant fast path via SMEM).
    Returns an array with the same shape as x (float32).
    """
    x = jnp.asarray(x, jnp.float32)
    y = jnp.asarray(y, jnp.float32)
    mu1 = jnp.asarray(mu1, jnp.float32)
    mu2 = jnp.asarray(mu2, jnp.float32)
    assert x.shape == y.shape
    out_shape = x.shape
    n = x.size

    scalar_mu = (mu1.size == 1 and mu2.size == 1)
    if not scalar_mu:
        assert mu1.shape == x.shape and mu2.shape == x.shape

    # Flat [N] views of the contiguous [N,1] columns (free reshapes).
    xf = x.reshape(-1)
    yf = y.reshape(-1)

    # Zero-copy fast path when N is lane-aligned; otherwise a small pad+trim.
    pad = 0 if n % _LANES == 0 else _LANES - (n % _LANES)
    if pad:
        xf = jnp.pad(xf, (0, pad))
        yf = jnp.pad(yf, (0, pad))
    rows = (n + pad) // _LANES

    br = _pick_block_rows(rows, block_rows)
    grid = (pl.cdiv(rows, br),)     # last row-block may be partial -> masked
    blk = pl.BlockSpec((br, _LANES), lambda i: (i, 0))
    cparams = pltpu.CompilerParams(
        dimension_semantics=("parallel",),      # shards steps across TCs (v7x)
        vmem_limit_bytes=_VMEM_LIMIT_BYTES,
    )

    x2d = xf.reshape(rows, _LANES)
    y2d = yf.reshape(rows, _LANES)

    if scalar_mu:
        mu = jnp.stack([mu1.reshape(()), mu2.reshape(())])      # (2,) f32
        out2d = pl.pallas_call(
            _my_feature_scalar_mu_kernel,
            out_shape=jax.ShapeDtypeStruct((rows, _LANES), jnp.float32),
            grid=grid,
            in_specs=[pl.BlockSpec(memory_space=pltpu.MemorySpace.SMEM),
                      blk, blk],
            out_specs=blk,
            compiler_params=cparams,
            cost_estimate=pl.CostEstimate(
                flops=6 * rows * _LANES,
                transcendentals=rows * _LANES,
                bytes_accessed=3 * 4 * rows * _LANES,   # x, y, out
            ),
        )(mu, x2d, y2d)
    else:
        m1f = mu1.reshape(-1)
        m2f = mu2.reshape(-1)
        if pad:
            m1f = jnp.pad(m1f, (0, pad))
            m2f = jnp.pad(m2f, (0, pad))
        out2d = pl.pallas_call(
            _my_feature_kernel,
            out_shape=jax.ShapeDtypeStruct((rows, _LANES), jnp.float32),
            grid=grid,
            in_specs=[blk, blk, blk, blk],
            out_specs=blk,
            compiler_params=cparams,
            cost_estimate=pl.CostEstimate(
                flops=6 * rows * _LANES,
                transcendentals=rows * _LANES,
                bytes_accessed=5 * 4 * rows * _LANES,   # 4 inputs + 1 output
            ),
        )(x2d, y2d, m1f.reshape(rows, _LANES), m2f.reshape(rows, _LANES))

    flat = out2d.reshape(-1)
    if pad:
        flat = flat[:n]
    return flat.reshape(out_shape)


# ----------------------------------------------------------------------------
# demo / correctness check
# ----------------------------------------------------------------------------
if __name__ == "__main__":
    key = jax.random.PRNGKey(0)
    k1, k2, k3, k4, k5, k6 = jax.random.split(key, 6)

    # Case 1: exact module semantics -- four [N,1] columns, N not 128-aligned.
    N = 1000
    x = jax.random.uniform(k1, (N, 1), jnp.float32, minval=-1.0, maxval=1.0)
    y = jax.random.uniform(k2, (N, 1), jnp.float32, minval=-1.0, maxval=1.0)
    mu1 = jax.random.uniform(k3, (N, 1), jnp.float32, minval=-1.0, maxval=1.0)
    mu2 = jax.random.uniform(k4, (N, 1), jnp.float32, minval=-1.0, maxval=1.0)
    out = jax.block_until_ready(my_feature(x, y, mu1, mu2))
    ref = jnp.exp(-2.0 * (x - mu1) ** 2 - 2.0 * (y - mu2) ** 2)
    assert out.shape == (N, 1)
    assert jnp.allclose(out, ref, atol=1e-6, rtol=1e-6)

    # Case 2: 128-aligned N -> zero-copy fast path; rows=44, br=8 -> grid of 6
    # steps with a masked partial final row-block (no host pad/trim).
    N2 = 44 * 128
    x2 = jax.random.uniform(k1, (N2, 1), jnp.float32, minval=-1.0, maxval=1.0)
    y2 = jax.random.uniform(k2, (N2, 1), jnp.float32, minval=-1.0, maxval=1.0)
    m12 = jax.random.uniform(k3, (N2, 1), jnp.float32, minval=-1.0, maxval=1.0)
    m22 = jax.random.uniform(k4, (N2, 1), jnp.float32, minval=-1.0, maxval=1.0)
    out2 = jax.block_until_ready(my_feature(x2, y2, m12, m22))
    ref2 = jnp.exp(-2.0 * (x2 - m12) ** 2 - 2.0 * (y2 - m22) ** 2)
    assert out2.shape == (N2, 1)
    assert jnp.allclose(out2, ref2, atol=1e-6, rtol=1e-6)

    # Case 3: batch-constant mu1/mu2 passed as scalars -> SMEM path (3 streams).
    mu1_s = jax.random.uniform(k5, (), jnp.float32, minval=-1.0, maxval=1.0)
    mu2_s = jax.random.uniform(k6, (), jnp.float32, minval=-1.0, maxval=1.0)
    out3 = jax.block_until_ready(my_feature(x2, y2, mu1_s, mu2_s))
    ref3 = jnp.exp(-2.0 * (x2 - mu1_s) ** 2 - 2.0 * (y2 - mu2_s) ** 2)
    assert out3.shape == (N2, 1)
    assert jnp.allclose(out3, ref3, atol=1e-6, rtol=1e-6)

    print("KERNEL_OK")
</pallas_src>

<mosaic_0001>
module attributes {stable_mosaic.version = 11 : i64} {
  func.func @_my_feature_kernel(%arg0: i32, %arg1: memref<8x128xf32, #tpu.memory_space<vmem>>, %arg2: memref<8x128xf32, #tpu.memory_space<vmem>>, %arg3: memref<8x128xf32, #tpu.memory_space<vmem>>, %arg4: memref<8x128xf32, #tpu.memory_space<vmem>>, %arg5: memref<8x128xf32, #tpu.memory_space<vmem>>) attributes {dimension_semantics = [#tpu.dimension_semantics<parallel>], iteration_bounds = array<i64: 1>, scalar_prefetch = 0 : i64, scratch_operands = 0 : i64, tpu.core_type = #tpu.core_type<tc>, window_params = [{transform_indices = @transform_0, window_bounds = array<i64: 8, 128>}, {transform_indices = @transform_1, window_bounds = array<i64: 8, 128>}, {transform_indices = @transform_2, window_bounds = array<i64: 8, 128>}, {transform_indices = @transform_3, window_bounds = array<i64: 8, 128>}, {transform_indices = @transform_4, window_bounds = array<i64: 8, 128>}]} {
    %c0 = arith.constant 0 : index
    %c0_0 = arith.constant 0 : index
    %0 = vector.load %arg1[%c0, %c0_0] : memref<8x128xf32, #tpu.memory_space<vmem>>, vector<8x128xf32>
    %c0_1 = arith.constant 0 : index
    %c0_2 = arith.constant 0 : index
    %1 = vector.load %arg3[%c0_1, %c0_2] : memref<8x128xf32, #tpu.memory_space<vmem>>, vector<8x128xf32>
    %2 = arith.subf %0, %1 : vector<8x128xf32>
    %c0_3 = arith.constant 0 : index
    %c0_4 = arith.constant 0 : index
    %3 = vector.load %arg2[%c0_3, %c0_4] : memref<8x128xf32, #tpu.memory_space<vmem>>, vector<8x128xf32>
    %c0_5 = arith.constant 0 : index
    %c0_6 = arith.constant 0 : index
    %4 = vector.load %arg4[%c0_5, %c0_6] : memref<8x128xf32, #tpu.memory_space<vmem>>, vector<8x128xf32>
    %5 = arith.subf %3, %4 : vector<8x128xf32>
    %6 = arith.mulf %2, %2 : vector<8x128xf32>
    %7 = arith.mulf %5, %5 : vector<8x128xf32>
    %8 = arith.addf %6, %7 : vector<8x128xf32>
    %cst = arith.constant -2.000000e+00 : f32
    %9 = vector.broadcast %cst : f32 to vector<8x128xf32>
    %10 = arith.mulf %9, %8 : vector<8x128xf32>
    %11 = math.exp %10 : vector<8x128xf32>
    %c0_7 = arith.constant 0 : index
    %c0_8 = arith.constant 0 : index
    %12 = vector.load %arg5[%c0_7, %c0_8] : memref<8x128xf32, #tpu.memory_space<vmem>>, vector<8x128xf32>
    tpu.vector_store %arg5[%c0_7, %c0_8], %11 {strides = array<i32>} : memref<8x128xf32, #tpu.memory_space<vmem>>, vector<8x128xf32>,
    return
  }
  func.func @transform_0(%arg0: i32) -> (i32, i32) {
    %c0_i32 = arith.constant 0 : i32
    %c0_i32_0 = arith.constant 0 : i32
    return %arg0, %c0_i32 : i32, i32
  }
  func.func @transform_1(%arg0: i32) -> (i32, i32) {
    %c0_i32 = arith.constant 0 : i32
    %c0_i32_0 = arith.constant 0 : i32
    return %arg0, %c0_i32 : i32, i32
  }
  func.func @transform_2(%arg0: i32) -> (i32, i32) {
    %c0_i32 = arith.constant 0 : i32
    %c0_i32_0 = arith.constant 0 : i32
    return %arg0, %c0_i32 : i32, i32
  }
  func.func @transform_3(%arg0: i32) -> (i32, i32) {
    %c0_i32 = arith.constant 0 : i32
    %c0_i32_0 = arith.constant 0 : i32
    return %arg0, %c0_i32 : i32, i32
  }
  func.func @transform_4(%arg0: i32) -> (i32, i32) {
    %c0_i32 = arith.constant 0 : i32
    %c0_i32_0 = arith.constant 0 : i32
    return %arg0, %c0_i32 : i32, i32
  }
}

</mosaic_0001>

<bundles_post_ra>
// kernel: tpu_custom_call.1
= control target key start
LH: loop header
LB: loop body
LE: loop exit
PB: predicated region body
PF: predicated region fallthrough
CT: control target
= control target key end

     0   :  { %9 = vsyncpa [#allocation3], 0  ;;  %s255_s0 = inlined_call_operand.hbm [shape: f32[8,128], index: 0, kind: input, shape index: {}]   ;;  %s256_s1 = inlined_call_operand.hbm [shape: f32[8,128], index: 1, kind: input, shape index: {}]   ;;  %s257_s2 = inlined_call_operand.hbm [shape: f32[8,128], index: 2, kind: input, shape index: {}]   ;;  %s258_s3 = inlined_call_operand.hbm [shape: f32[8,128], index: 3, kind: input, shape index: {}]   ;;  %s259_s4 = inlined_call_operand.hbm [shape: f32[8,128], index: 4, kind: output, shape index: {}]  }
   0x1   :  { %10 = vsyncpa [#allocation6], 0 }
   0x2   :  { %11 = vsyncpa [#allocation9], 0 }
   0x3   :  { %12 = vsyncpa [#allocation4], 0  ;;  %s210_s15 = smov [#allocation5]   ;;  %s211_s17 = smov [#allocation2]  }
   0x4   :  { %s29_s16 = sshll.u32 %s210_s15, 4  ;;  %s19_s18 = sshll.u32 %s211_s17, 4  ;;  %s30_s16 = int_to_ptr.vmem [resolvable:$true] %s29_s16  ;;  %s20_s18 = int_to_ptr.vmem [resolvable:$true] %s19_s18 }
   0x5   :  { %s110_s19 = scalar_lea.vmem %s30_s16, 128  ;;  %p115_p1 = scmp.lt.s32.totalorder %s30_s16, %s30_s16 }
   0x6   :  { %p111_p0 = scmp.ne.s32.totalorder %s30_s16, %s110_s19  ;;  %p116_p2 = scmp.lt.s32.totalorder %s110_s19, %s110_s19 }
   0x8   :  { %p117_p3 = por %p116_p2, %p115_p1 }
   0xa   :  { %p118_p4 = pnand %p117_p3, %p111_p0 }
   0xc   :  { %121 = shalt.err (!%p118_p4)
}
   0xd   :  { %32 = dma.hbm_to_vmem [thread:$0]  %s256_s1, 128, %s30_s16, [#allocation6]  }
   0xe   :  { %s130_s22 = scalar_lea.vmem %s20_s18, 128  ;;  %p135_p6 = scmp.lt.s32.totalorder %s20_s18, %s20_s18 }
   0xf   :  { %p131_p5 = scmp.ne.s32.totalorder %s20_s18, %s130_s22  ;;  %p136_p7 = scmp.lt.s32.totalorder %s130_s22, %s130_s22 }
  0x11   :  { %p137_p8 = por %p136_p7, %p135_p6 }
  0x13   :  { %p138_p9 = pnand %p137_p8, %p131_p5 }
  0x15   :  { %141 = shalt.err (!%p138_p9)
}
  0x16   :  { %22 = dma.hbm_to_vmem [thread:$0]  %s255_s0, 128, %s20_s18, [#allocation3]  }
  0x17   :  { %s212_s25 = smov [#allocation7]   ;;  %s213_s27 = smov [#allocation8]  }
  0x18   :  { %s39_s26 = sshll.u32 %s212_s25, 4  ;;  %s49_s28 = sshll.u32 %s213_s27, 4  ;;  %s40_s26 = int_to_ptr.vmem [resolvable:$true] %s39_s26  ;;  %s50_s28 = int_to_ptr.vmem [resolvable:$true] %s49_s28 }
  0x19   :  { %s150_s29 = scalar_lea.vmem %s40_s26, 128  ;;  %p155_p11 = scmp.lt.s32.totalorder %s40_s26, %s40_s26 }
  0x1a   :  { %p151_p10 = scmp.ne.s32.totalorder %s40_s26, %s150_s29  ;;  %p156_p12 = scmp.lt.s32.totalorder %s150_s29, %s150_s29 }
  0x1c   :  { %p157_p13 = por %p156_p12, %p155_p11 }
  0x1e   :  { %p158_p0 = pnand %p157_p13, %p151_p10 }
  0x20   :  { %161 = shalt.err (!%p158_p0)
}
  0x21   :  { %42 = dma.hbm_to_vmem [thread:$0]  %s257_s2, 128, %s40_s26, [#allocation6]  }
  0x22   :  { %s170_s5 = scalar_lea.vmem %s50_s28, 128  ;;  %p175_p2 = scmp.lt.s32.totalorder %s50_s28, %s50_s28 }
  0x23   :  { %p171_p1 = scmp.ne.s32.totalorder %s50_s28, %s170_s5  ;;  %p176_p3 = scmp.lt.s32.totalorder %s170_s5, %s170_s5 }
  0x25   :  { %p177_p4 = por %p176_p3, %p175_p2 }
  0x27   :  { %p178_p5 = pnand %p177_p4, %p171_p1 }
  0x29   :  { %181 = shalt.err (!%p178_p5)
}
  0x2a   :  { %52 = dma.hbm_to_vmem [thread:$0]  %s258_s3, 128, %s50_s28, [#allocation9]  }
  0x2b   :  { %202 = dma.done.wait [#allocation3], 128  }
  0x2c   :  { %203 = vsyncadd [#allocation3], 4294967168 }
  0x2d   :  { %204 = dma.done.wait [#allocation6], 256  }
  0x2e   :  { %205 = vsyncadd [#allocation6], 4294967040 }
  0x2f   :  { %206 = dma.done.wait [#allocation9], 128  }
  0x30   :  { %207 = vsyncadd [#allocation9], 4294967168  ;;  %v65_v0 = vld [vmem:[#allocation2] sm:$0xff]  ;;  %v66_v1 = vld [vmem:[#allocation7] sm:$0xff]  ;;  %s214_s2 = smov [#allocation10]  }
  0x31   :  { %v68_v2 = vld [vmem:[#allocation5] sm:$0xff]  ;;  %v67_v3 = vsub.f32 %v65_v0, %v66_v1  ;;  %v69_v4 = vld [vmem:[#allocation8] sm:$0xff]  ;;  %s84_s3 = sshll.u32 %s214_s2, 4  ;;  %s85_s3 = int_to_ptr.vmem [resolvable:$true] %s84_s3 }
  0x32   :  { %v70_v5 = vsub.f32 %v68_v2, %v69_v4  ;;  %s182_s7 = scalar_lea.vmem %s85_s3, 128  ;;  %p187_p7 = scmp.lt.s32.totalorder %s85_s3, %s85_s3 }
  0x33   :  { %v71_v6 = vmul.f32 %v67_v3, %v67_v3  ;;  %p183_p6 = scmp.ne.s32.totalorder %s85_s3, %s182_s7  ;;  %p188_p8 = scmp.lt.s32.totalorder %s182_s7, %s182_s7 }
  0x34   :  { %v72_v7 = vmul.f32 %v70_v5, %v70_v5 }
  0x35   :  { %p189_p9 = por %p188_p8, %p187_p7 }
  0x36   :  { %v73_v8 = vadd.f32 %v72_v7, %v71_v6 }
  0x37   :  { %p190_p10 = pnand %p189_p9, %p183_p6 }
  0x38   :  { %v74_v9 = vmul.f32 -2.0, %v73_v8 }
  0x3a   :  { %v75_v10 = vmul.f32 1.442695, %v74_v9 }
  0x3c   :  { %100 = vpow2.f32 %v75_v10 }
  0x49   :  { %v101_v11 = vpop.eup %100 }
  0x4a   :  { %77 = vst [vmem:[#allocation10] sm:$0xff] %v101_v11 }
  0x4b   :  { %193 = shalt.err (!%p190_p10)
}
  0x4c   :  { %87 = dma.vmem_to_hbm [thread:$0]  %s85_s3, 128, %s259_s4, [#allocation4]  }
  0x4d   :  { %208 = dma.done.wait [#allocation4], 128  }
  0x4e   :  { %209 = vsyncadd [#allocation4], 4294967168 }
  0x4f   :  { %91 = vsyncpa [#allocation3], 1 }
  0x50   :  { %92 = vsyncpa [#allocation6], 1 }
  0x51   :  { %93 = vsyncpa [#allocation9], 1 }
  0x52   :  { %94 = vsyncpa [#allocation4], 1 }

</bundles_post_ra>
